<compile_context>
chip_gen: v7x
topology: tpu7x:2x2x1
jax: 0.10.0
libtpu: 0.0.40
codegen_flags: <defaults>
</compile_context>

<pallas_src>
import functools

import jax
import jax.numpy as jnp
from jax.experimental import pallas as pl
from jax.experimental.pallas import tpu as pltpu


def _jab_hips_kernel(blend_ref, x_ref, o_ref, *, root_index, left_hip_index,
                     right_hip_index, D):
    x = x_ref[...]                                   # (B, Lp) lane-dense, padded
    xf = x.astype(jnp.float32)
    blend = blend_ref[0, 0]                          # runtime f32 scalar (SMEM)

    Lp = x.shape[-1]
    r0 = root_index * D
    l0 = left_hip_index * D
    rg = right_hip_index * D

    lane = jax.lax.broadcasted_iota(jnp.int32, xf.shape, dimension=1)
    left_mask = (lane >= l0) & (lane < l0 + D)
    right_mask = (lane >= rg) & (lane < rg + D)

    # Align the root coordinates under the hip lanes (XLU lane rotation,
    # co-issues with the VPU blend below).
    root_for_left = pltpu.roll(xf, shift=(l0 - r0) % Lp, axis=1)
    root_for_right = pltpu.roll(xf, shift=(rg - r0) % Lp, axis=1)
    root = jnp.where(left_mask, root_for_left, root_for_right)

    blended = xf + blend * (root - xf)
    out = jnp.where(left_mask | right_mask, blended, xf)
    o_ref[...] = out.astype(o_ref.dtype)             # single unmasked store


@functools.partial(
    jax.jit,
    static_argnames=("root_index", "left_hip_index", "right_hip_index"))
def jab_hips(joints: jax.Array,
             blend=0.7,
             *,
             root_index: int = 0,
             left_hip_index: int = 1,
             right_hip_index: int = 4) -> jax.Array:
    # The single-pass formulation matches the PyTorch sequential in-place
    # updates only when the three indices are pairwise distinct.
    assert root_index != left_hip_index
    assert root_index != right_hip_index
    assert left_hip_index != right_hip_index

    B, J, D = joints.shape
    L = J * D
    Lp = ((L + 127) // 128) * 128                    # pad to 128-lane multiple

    flat = joints.reshape(B, L)
    flat = jnp.pad(flat, ((0, 0), (0, Lp - L)))
    blend_arr = jnp.asarray(blend, dtype=jnp.float32).reshape(1, 1)

    kernel = functools.partial(
        _jab_hips_kernel,
        root_index=root_index,
        left_hip_index=left_hip_index,
        right_hip_index=right_hip_index,
        D=D,
    )

    out = pl.pallas_call(
        kernel,
        out_shape=jax.ShapeDtypeStruct((B, Lp), joints.dtype),
        in_specs=[
            pl.BlockSpec(memory_space=pltpu.SMEM),   # blend scalar
            pl.BlockSpec(memory_space=pltpu.VMEM),   # padded joints slab
        ],
        out_specs=pl.BlockSpec(memory_space=pltpu.VMEM),
        input_output_aliases={1: 0},                 # semantically in-place
        cost_estimate=pl.CostEstimate(
            flops=6 * B * D,
            transcendentals=0,
            bytes_accessed=2 * B * L * joints.dtype.itemsize,
        ),
    )(blend_arr, flat)
    return out[:, :L].reshape(B, J, D)


def _reference(joints, blend=0.7, root_index=0, left_hip_index=1,
               right_hip_index=4):
    # Pure-JAX reference matching the PyTorch in-place semantics.
    root = joints[:, root_index, :]
    new_left = joints[:, left_hip_index, :] + blend * (root - joints[:, left_hip_index, :])
    new_right = joints[:, right_hip_index, :] + blend * (root - joints[:, right_hip_index, :])
    j = joints.at[:, left_hip_index, :].set(new_left)
    j = j.at[:, right_hip_index, :].set(new_right)
    return j


if __name__ == "__main__":
    key = jax.random.PRNGKey(0)
    # batch=2, 25 OpenPose body joints, 3D coordinates.
    joints = jax.random.normal(key, (2, 25, 3), dtype=jnp.float32)

    out = jax.block_until_ready(jab_hips(joints))
    ref = _reference(joints)
    assert out.shape == joints.shape and out.dtype == joints.dtype
    assert jnp.allclose(out, ref, atol=1e-6, rtol=1e-6)

    # Different blend value reuses the same compiled kernel (runtime SMEM scalar).
    out2 = jax.block_until_ready(jab_hips(joints, 0.3))
    ref2 = _reference(joints, blend=0.3)
    assert jnp.allclose(out2, ref2, atol=1e-6, rtol=1e-6)

    print("KERNEL_OK")
</pallas_src>

<mosaic_0001>
module attributes {stable_mosaic.version = 11 : i64} {
  func.func @_jab_hips_kernel(%arg0: memref<1x1xf32, #tpu.memory_space<smem>>, %arg1: memref<2x128xf32, #tpu.memory_space<vmem>>, %arg2: memref<2x128xf32, #tpu.memory_space<vmem>>) attributes {dimension_semantics = [], scalar_prefetch = 0 : i64, scratch_operands = 0 : i64, tpu.core_type = #tpu.core_type<tc>} {
    %c0 = arith.constant 0 : index
    %c0_0 = arith.constant 0 : index
    %0 = vector.load %arg1[%c0, %c0_0] : memref<2x128xf32, #tpu.memory_space<vmem>>, vector<2x128xf32>
    %c0_1 = arith.constant 0 : index
    %c0_2 = arith.constant 0 : index
    %1 = memref.load %arg0[%c0_1, %c0_2] : memref<1x1xf32, #tpu.memory_space<smem>>
    %2 = tpu.iota {dimensions = array<i32: 1>} : vector<2x128xi32>
    %c3_i32 = arith.constant 3 : i32
    %3 = vector.broadcast %c3_i32 : i32 to vector<2x128xi32>
    %4 = arith.cmpi sge, %2, %3 : vector<2x128xi32>
    %c6_i32 = arith.constant 6 : i32
    %5 = vector.broadcast %c6_i32 : i32 to vector<2x128xi32>
    %6 = arith.cmpi slt, %2, %5 : vector<2x128xi32>
    %7 = arith.andi %4, %6 : vector<2x128xi1>
    %c12_i32 = arith.constant 12 : i32
    %8 = vector.broadcast %c12_i32 : i32 to vector<2x128xi32>
    %9 = arith.cmpi sge, %2, %8 : vector<2x128xi32>
    %c15_i32 = arith.constant 15 : i32
    %10 = vector.broadcast %c15_i32 : i32 to vector<2x128xi32>
    %11 = arith.cmpi slt, %2, %10 : vector<2x128xi32>
    %12 = arith.andi %9, %11 : vector<2x128xi1>
    %c3_i32_3 = arith.constant 3 : i32
    %13 = tpu.dynamic_rotate %0 by %c3_i32_3 dim 1 : vector<2x128xf32>, i32 -> vector<2x128xf32>
    %c12_i32_4 = arith.constant 12 : i32
    %14 = tpu.dynamic_rotate %0 by %c12_i32_4 dim 1 : vector<2x128xf32>, i32 -> vector<2x128xf32>
    %15 = arith.select %7, %13, %14 : vector<2x128xi1>, vector<2x128xf32>
    %16 = arith.subf %15, %0 : vector<2x128xf32>
    %17 = vector.broadcast %1 : f32 to vector<2x128xf32>
    %18 = arith.mulf %17, %16 : vector<2x128xf32>
    %19 = arith.addf %0, %18 : vector<2x128xf32>
    %20 = arith.ori %7, %12 : vector<2x128xi1>
    %21 = arith.select %20, %19, %0 : vector<2x128xi1>, vector<2x128xf32>
    %c0_5 = arith.constant 0 : index
    %c0_6 = arith.constant 0 : index
    %22 = vector.load %arg2[%c0_5, %c0_6] : memref<2x128xf32, #tpu.memory_space<vmem>>, vector<2x128xf32>
    tpu.vector_store %arg2[%c0_5, %c0_6], %21 {strides = array<i32>} : memref<2x128xf32, #tpu.memory_space<vmem>>, vector<2x128xf32>,
    return
  }
}

</mosaic_0001>

<bundles_post_ra>
// kernel: jab_hips.1
= control target key start
LH: loop header
LB: loop body
LE: loop exit
PB: predicated region body
PF: predicated region fallthrough
CT: control target
= control target key end

     0   :  { %s40_s11 = smov 3   ;;  %s41_s12 = smov 12   ;;  %v14_v1 = vlaneseq  ;;  %s66_s1 = inlined_call_operand.vmem [shape: f32[2,128], index: 1, kind: input, shape index: {}, may-alias: {1,2}]   ;;  %s67_s0 = inlined_call_operand.<no memory space> [shape: f32[1,1], index: 0, kind: input, shape index: {}]   ;;  %s68_s2 = inlined_call_operand.vmem [shape: f32[2,128], index: 2, kind: output, shape index: {}, may-alias: {1,2}]  }
   0x1   :  { %v12_v0 = vld [vmem:[%s66_s1] sm:$0x3]  ;;  %v28_v6 = vstv %s67_s0 }
   0x2   :  { %22 = vrot.lane.b32.xlu0 %v12_v0, %s40_s11  ;;  %v15_v2 = vand.u32 127, %v14_v1 }
   0x4   :  { %vm16_vm0 = vcmp.ge.s32.totalorder %v15_v2, 3  ;;  %vm17_vm1 = vcmp.lt.s32.totalorder %v15_v2, 6  ;;  %vm19_vm3 = vcmp.ge.s32.totalorder %v15_v2, 12  ;;  %vm20_vm4 = vcmp.lt.s32.totalorder %v15_v2, 15 }
   0x5   :  { %vm18_vm2 = vmand %vm16_vm0, %vm17_vm1 }
   0x6   :  { %24 = vrot.lane.b32.xlu0 %v12_v0, %s41_s12  ;;  %vm21_vm5 = vmand %vm19_vm3, %vm20_vm4 }
   0x7   :  { %vm31_vm6 = vmor %vm18_vm2, %vm21_vm5 }
  0x74   :  { %v23_v3 = vpop.permute.xlu0 %22 }
  0x78   :  { %v25_v4 = vpop.permute.xlu0 %24 }
  0x79   :  { %v26_v5 = vsel %vm18_vm2, %v23_v3, %v25_v4 }
  0x7a   :  { %v27_v7 = vsub.f32 %v26_v5, %v12_v0 }
  0x7c   :  { %v29_v8 = vmul.f32 %v28_v6, %v27_v7 }
  0x7e   :  { %v30_v9 = vadd.f32 %v29_v8, %v12_v0 }
  0x80   :  { %v32_v10 = vsel %vm31_vm6, %v30_v9, %v12_v0 }
  0x81   :  { %33 = vst [vmem:[%s68_s2] sm:$0x3] %v32_v10 }

</bundles_post_ra>
